<compile_context>
chip_gen: v7x
topology: tpu7x:2x2x1
jax: 0.10.0
libtpu: 0.0.40
codegen_flags: <defaults>
</compile_context>

<pallas_src>
import functools

import jax
import jax.numpy as jnp
from jax import lax
from jax.experimental import pallas as pl
from jax.experimental.pallas import tpu as pltpu


def _contrastive_loss_kernel(anchor_ref, x_ref, sim_ref, out_ref, *,
                             margin, batch, tile_b):
    # anchor_ref, x_ref : (tile_b, E) VMEM tiles (native input dtype)
    # sim_ref           : (b_pad, 1) f32, VMEM-resident for the whole kernel
    # out_ref           : (1, 8, 128) f32 block holding this tile's partial sum
    a = anchor_ref[...].astype(jnp.float32)
    b = x_ref[...].astype(jnp.float32)
    diff = a - b                                        # VPU
    d2 = jnp.sum(diff * diff, axis=1, keepdims=True)    # (tile_b, 1) XLU reduce
    d = jnp.sqrt(d2)                                    # EUP

    start = pl.program_id(0) * tile_b
    if tile_b % 8 == 0:
        start = pl.multiple_of(start, 8)
    sim = sim_ref[pl.ds(start, tile_b), :]              # (tile_b, 1) f32

    hinge = jnp.maximum(margin - d, 0.0)                # relu(margin - distance)
    res = sim * d2 + (1.0 - sim) * hinge * hinge        # (tile_b, 1)

    # Mask rows past the true batch size (the last tile may overhang B and
    # read Pallas block padding). B is static -> no scalar prefetch needed.
    rows = start + lax.broadcasted_iota(jnp.int32, (tile_b, 1), 0)
    res = jnp.where(rows < batch, res, 0.0)

    # Lane-dense, unmasked full-vreg store of the per-tile partial sum.
    out_ref[...] = jnp.broadcast_to(jnp.sum(res), (1, 8, 128))


def _pick_tile_b(batch, E, itemsize):
    # Per-grid-step VMEM:
    #   double-buffered inputs : 2 arrays x 2 buffers x tile_b x E x itemsize
    #   f32 body temporaries   : ~3      x tile_b x E x 4   (a, b, diff*diff)
    # Keep the total under ~12 MiB so it fits v5e's 16 MiB scoped-VMEM default
    # (and v7x's 32 MiB scoped / 64 MiB physical) without vmem_limit_bytes.
    # TODO(synk): on v6e, a larger budget backed by vmem_limit_bytes (and for
    # very large E, an inner E-chunk accumulation loop) would allow bigger
    # tiles; kept conservative here for a single portable code path.
    budget = 12 * 1024 * 1024
    per_row = E * (4 * itemsize + 3 * 4)
    tile_b = max(8, (budget // max(1, per_row)) // 8 * 8)

    if batch > 8:
        # v7x megacore: prefer >= 2 tiles so the "parallel" grid axis can be
        # sharded across both TensorCores (one extra ~0.35us step elsewhere).
        half = -(-batch // 2)
        half = ((half + 7) // 8) * 8
        tile_b = min(tile_b, half)

    b_round = ((batch + 7) // 8) * 8
    return max(8, min(tile_b, b_round))


def contrastive_loss(anchor, x, similarity, *, margin=2.0, average=True,
                     tile_b=None):
    """Pallas TPU implementation of ContrastiveLoss.forward."""
    B, E = anchor.shape
    itemsize = jnp.dtype(anchor.dtype).itemsize

    if tile_b is None:
        tile_b = _pick_tile_b(B, E, itemsize)
    if B < 8:
        tile_b = B                      # single full block, no alignment needed
    else:
        tile_b = max(8, (tile_b // 8) * 8)

    num_tiles = -(-B // tile_b)
    b_pad = num_tiles * tile_b

    # similarity is tiny (B*4 bytes): pad it to the grid extent and keep it
    # resident in VMEM; padded rows are masked in-kernel anyway.
    sim2d = similarity.reshape(B, 1).astype(jnp.float32)
    if b_pad != B:
        sim2d = jnp.pad(sim2d, ((0, b_pad - B), (0, 0)))

    kernel = functools.partial(_contrastive_loss_kernel, margin=float(margin),
                               batch=B, tile_b=tile_b)

    out = pl.pallas_call(
        kernel,
        out_shape=jax.ShapeDtypeStruct((num_tiles, 8, 128), jnp.float32),
        grid=(num_tiles,),
        in_specs=[
            pl.BlockSpec((tile_b, E), lambda i: (i, 0)),
            pl.BlockSpec((tile_b, E), lambda i: (i, 0)),
            pl.BlockSpec((b_pad, 1), lambda i: (0, 0)),   # resident, fetched once
        ],
        out_specs=pl.BlockSpec((1, 8, 128), lambda i: (i, 0, 0)),
        compiler_params=pltpu.CompilerParams(
            dimension_semantics=("parallel",)),
        cost_estimate=pl.CostEstimate(
            flops=4 * B * E + 10 * B,
            transcendentals=B,
            bytes_accessed=2 * B * E * itemsize + b_pad * 4
                           + num_tiles * 8 * 128 * 4),
    )(anchor, x, sim2d)

    total = jnp.sum(out[:, 0, 0])       # num_tiles scalars
    return total / B if average else total


def _reference_loss(anchor, x, similarity, margin=2.0, average=True):
    # Pure-JAX reference mirroring the PyTorch forward (computed in f32).
    a = anchor.astype(jnp.float32)
    b = x.astype(jnp.float32)
    s = similarity.astype(jnp.float32)
    d = jnp.sqrt(jnp.sum((a - b) ** 2, axis=1))
    res = s * d ** 2 + (1 - s) * jnp.maximum(margin - d, 0.0) ** 2
    return jnp.mean(res) if average else jnp.sum(res)


if __name__ == "__main__":
    key = jax.random.PRNGKey(0)
    ks = jax.random.split(key, 9)

    # Test 1: small f32 batch, mean aggregation, single-tile path.
    B, E = 8, 32
    anchor = jax.random.normal(ks[0], (B, E), dtype=jnp.float32)
    x = jax.random.normal(ks[1], (B, E), dtype=jnp.float32)
    similarity = jax.random.bernoulli(ks[2], 0.5, (B,)).astype(jnp.float32)

    loss = contrastive_loss(anchor, x, similarity, margin=2.0, average=True)
    loss = jax.block_until_ready(loss)
    ref = _reference_loss(anchor, x, similarity, margin=2.0, average=True)
    assert jnp.allclose(loss, ref, rtol=1e-5, atol=1e-5), (loss, ref)

    # Test 2: bf16 inputs, sum aggregation, forced small tile -> multi-tile
    # path with a partial (masked) last tile (B=20 -> 3 tiles of 8).
    B2, E2 = 20, 32
    anchor2 = jax.random.normal(ks[3], (B2, E2), dtype=jnp.float32).astype(jnp.bfloat16)
    x2 = jax.random.normal(ks[4], (B2, E2), dtype=jnp.float32).astype(jnp.bfloat16)
    sim2 = jax.random.bernoulli(ks[5], 0.5, (B2,)).astype(jnp.float32)

    loss2 = contrastive_loss(anchor2, x2, sim2, margin=2.0, average=False,
                             tile_b=8)
    loss2 = jax.block_until_ready(loss2)
    ref2 = _reference_loss(anchor2, x2, sim2, margin=2.0, average=False)
    assert jnp.allclose(loss2, ref2, rtol=1e-4, atol=1e-4), (loss2, ref2)

    # Test 3: default tile picker -> 2 tiles (v7x megacore split) + masked
    # last tile, f32, mean aggregation.
    B3, E3 = 40, 256
    anchor3 = jax.random.normal(ks[6], (B3, E3), dtype=jnp.float32)
    x3 = jax.random.normal(ks[7], (B3, E3), dtype=jnp.float32)
    sim3 = jax.random.bernoulli(ks[8], 0.5, (B3,)).astype(jnp.float32)

    loss3 = contrastive_loss(anchor3, x3, sim3, margin=2.0, average=True)
    loss3 = jax.block_until_ready(loss3)
    ref3 = _reference_loss(anchor3, x3, sim3, margin=2.0, average=True)
    assert jnp.allclose(loss3, ref3, rtol=1e-5, atol=1e-5), (loss3, ref3)

    print("KERNEL_OK")
</pallas_src>

<mosaic_0001>
module attributes {stable_mosaic.version = 11 : i64} {
  func.func @_contrastive_loss_kernel(%arg0: i32, %arg1: memref<8x32xf32, #tpu.memory_space<vmem>>, %arg2: memref<8x32xf32, #tpu.memory_space<vmem>>, %arg3: memref<8x1xf32, #tpu.memory_space<vmem>>, %arg4: memref<1x8x128xf32, #tpu.memory_space<vmem>>) attributes {dimension_semantics = [#tpu.dimension_semantics<parallel>], iteration_bounds = array<i64: 1>, scalar_prefetch = 0 : i64, scratch_operands = 0 : i64, tpu.core_type = #tpu.core_type<tc>, window_params = [{transform_indices = @transform_0, window_bounds = array<i64: 8, 32>}, {transform_indices = @transform_1, window_bounds = array<i64: 8, 32>}, {pipeline_mode = #tpu.pipeline_mode<synchronous>, transform_indices = @transform_2, window_bounds = array<i64: 8, 1>}, {transform_indices = @transform_3, window_bounds = array<i64: 1, 8, 128>}]} {
    %c0 = arith.constant 0 : index
    %c0_0 = arith.constant 0 : index
    %0 = vector.load %arg1[%c0, %c0_0] : memref<8x32xf32, #tpu.memory_space<vmem>>, vector<8x32xf32>
    %c0_1 = arith.constant 0 : index
    %c0_2 = arith.constant 0 : index
    %1 = vector.load %arg2[%c0_1, %c0_2] : memref<8x32xf32, #tpu.memory_space<vmem>>, vector<8x32xf32>
    %2 = arith.subf %0, %1 : vector<8x32xf32>
    %3 = arith.mulf %2, %2 : vector<8x32xf32>
    %cst = arith.constant dense<0.000000e+00> : vector<8xf32>
    %4 = vector.multi_reduction <add>, %3, %cst [1] : vector<8x32xf32> to vector<8xf32>
    %5 = vector.shape_cast %4 : vector<8xf32> to vector<8x1xf32>
    %6 = math.sqrt %5 : vector<8x1xf32>
    %c8_i32 = arith.constant 8 : i32
    %7 = arith.muli %arg0, %c8_i32 : i32
    %8 = tpu.assume_multiple %7, 8 : i32
    %9 = arith.index_cast %8 : i32 to index
    %c0_3 = arith.constant 0 : index
    %10 = vector.load %arg3[%9, %c0_3] : memref<8x1xf32, #tpu.memory_space<vmem>>, vector<8x1xf32>
    %cst_4 = arith.constant 2.000000e+00 : f32
    %11 = vector.broadcast %cst_4 : f32 to vector<8x1xf32>
    %12 = arith.subf %11, %6 : vector<8x1xf32>
    %cst_5 = arith.constant 0.000000e+00 : f32
    %13 = vector.broadcast %cst_5 : f32 to vector<8x1xf32>
    %14 = arith.maximumf %12, %13 : vector<8x1xf32>
    %15 = arith.mulf %10, %5 : vector<8x1xf32>
    %cst_6 = arith.constant 1.000000e+00 : f32
    %16 = vector.broadcast %cst_6 : f32 to vector<8x1xf32>
    %17 = arith.subf %16, %10 : vector<8x1xf32>
    %18 = arith.mulf %17, %14 : vector<8x1xf32>
    %19 = arith.mulf %18, %14 : vector<8x1xf32>
    %20 = arith.addf %15, %19 : vector<8x1xf32>
    %21 = tpu.iota {dimensions = array<i32: 0>} : vector<8x1xi32>
    %22 = vector.broadcast %8 : i32 to vector<8x1xi32>
    %23 = arith.addi %22, %21 : vector<8x1xi32>
    %c8_i32_7 = arith.constant 8 : i32
    %24 = vector.broadcast %c8_i32_7 : i32 to vector<8x1xi32>
    %25 = arith.cmpi slt, %23, %24 : vector<8x1xi32>
    %cst_8 = arith.constant 0.000000e+00 : f32
    %26 = vector.broadcast %cst_8 : f32 to vector<8x1xf32>
    %27 = arith.select %25, %20, %26 : vector<8x1xi1>, vector<8x1xf32>
    %28 = vector.shape_cast %27 : vector<8x1xf32> to vector<1x8x1xf32>
    %cst_9 = arith.constant dense<0.000000e+00> : vector<1xf32>
    %29 = vector.multi_reduction <add>, %28, %cst_9 [1, 2] : vector<1x8x1xf32> to vector<1xf32>
    %30 = vector.shape_cast %29 : vector<1xf32> to vector<1x1x1xf32>
    %31 = vector.extract %30[0, 0, 0] : f32 from vector<1x1x1xf32>
    %32 = vector.broadcast %31 : f32 to vector<1x8x128xf32>
    %c0_10 = arith.constant 0 : index
    %c0_11 = arith.constant 0 : index
    %c0_12 = arith.constant 0 : index
    %33 = vector.load %arg4[%c0_10, %c0_11, %c0_12] : memref<1x8x128xf32, #tpu.memory_space<vmem>>, vector<1x8x128xf32>
    tpu.vector_store %arg4[%c0_10, %c0_11, %c0_12], %32 {strides = array<i32>} : memref<1x8x128xf32, #tpu.memory_space<vmem>>, vector<1x8x128xf32>,
    return
  }
  func.func @transform_0(%arg0: i32) -> (i32, i32) {
    %c0_i32 = arith.constant 0 : i32
    %c0_i32_0 = arith.constant 0 : i32
    return %arg0, %c0_i32 : i32, i32
  }
  func.func @transform_1(%arg0: i32) -> (i32, i32) {
    %c0_i32 = arith.constant 0 : i32
    %c0_i32_0 = arith.constant 0 : i32
    return %arg0, %c0_i32 : i32, i32
  }
  func.func @transform_2(%arg0: i32) -> (i32, i32) {
    %c0_i32 = arith.constant 0 : i32
    %c0_i32_0 = arith.constant 0 : i32
    %c0_i32_1 = arith.constant 0 : i32
    return %c0_i32, %c0_i32_0 : i32, i32
  }
  func.func @transform_3(%arg0: i32) -> (i32, i32, i32) {
    %c0_i32 = arith.constant 0 : i32
    %c0_i32_0 = arith.constant 0 : i32
    %c0_i32_1 = arith.constant 0 : i32
    return %arg0, %c0_i32, %c0_i32_0 : i32, i32, i32
  }
}

</mosaic_0001>

<bundles_post_ra>
// kernel: tpu_custom_call.1
= control target key start
LH: loop header
LB: loop body
LE: loop exit
PB: predicated region body
PF: predicated region fallthrough
CT: control target
= control target key end

     0   :  { %8 = vsyncpa [#allocation3], 0  ;;  %s192_s0 = inlined_call_operand.vmem [shape: f32[8,32], index: 0, kind: input, shape index: {}]   ;;  %s193_s1 = inlined_call_operand.hbm [shape: f32[8,32], index: 1, kind: input, shape index: {}]   ;;  %s194_s2 = inlined_call_operand.vmem [shape: f32[8,1], index: 2, kind: input, shape index: {}]   ;;  %s195_s3 = inlined_call_operand.hbm [shape: f32[1,8,128], index: 3, kind: output, shape index: {}]  }
   0x1   :  { %9 = vsyncpa [#allocation4], 0  ;;  %s140_s12 = smov [#allocation2]   ;;  %s92_s16 = scalar_lea.hbm %s193_s1, 128 }
   0x2   :  { %s18_s13 = sshll.u32 %s140_s12, 4  ;;  %p93_p0 = scmp.ne.s32.totalorder %s193_s1, %s92_s16  ;;  %s19_s13 = int_to_ptr.vmem [resolvable:$true] %s18_s13 }
   0x3   :  { %p96_p1 = scmp.lt.u32.totalorder %s92_s16, %s193_s1 }
   0x5   :  { %p98_p2 = pnand %p96_p1, %p93_p0 }
   0x7   :  { %101 = shalt.err (!%p98_p2)
}
   0x8   :  { %s102_s21 = scalar_lea.vmem %s19_s13, 128  ;;  %p107_p4 = scmp.lt.s32.totalorder %s19_s13, %s19_s13 }
   0x9   :  { %p103_p3 = scmp.ne.s32.totalorder %s19_s13, %s102_s21  ;;  %p108_p5 = scmp.lt.s32.totalorder %s102_s21, %s102_s21 }
   0xb   :  { %p109_p6 = por %p108_p5, %p107_p4 }
   0xd   :  { %p110_p7 = pnand %p109_p6, %p103_p3 }
   0xf   :  { %113 = shalt.err (!%p110_p7)
}
  0x10   :  { %21 = dma.hbm_to_vmem [thread:$0]  %s193_s1, 128, %s19_s13, [#allocation3]  }
  0x11   :  { %136 = dma.done.wait [#allocation3], 128  }
  0x12   :  { %137 = vsyncadd [#allocation3], 4294967168  ;;  %v27_v0 = vld [vmem:[%s192_s0] sm:$0xff]  ;;  %vm31_vm0 = vcmask 261120   ;;  %vm58_vm3 = vcmask 7168   ;;  %s141_s0 = smov [#allocation5]  }
  0x13   :  { %v28_v1 = vld [vmem:[#allocation2] sm:$0xff] }
  0x14   :  { %v29_v2 = vsub.f32 %v27_v0, %v28_v1  ;;  %v44_v11 = vld [vmem:[%s194_s2] sm:$0xff]  ;;  %s77_s2 = sshll.u32 %s141_s0, 4  ;;  %s78_s2 = int_to_ptr.vmem [resolvable:$true] %s77_s2 }
  0x15   :  { %v48_v13 = vsub.f32 1.0, %v44_v11  ;;  %s114_s28 = scalar_lea.vmem %s78_s2, 128  ;;  %p119_p9 = scmp.lt.s32.totalorder %s78_s2, %s78_s2 }
  0x16   :  { %v30_v3 = vmul.f32 %v29_v2, %v29_v2  ;;  %p115_p8 = scmp.ne.s32.totalorder %s78_s2, %s114_s28  ;;  %p120_p10 = scmp.lt.s32.totalorder %s114_s28, %s114_s28 }
  0x18   :  { %v32_v4 = vsel %vm31_vm0, %v30_v3, 0.0  ;;  %p121_p11 = por %p120_p10, %p119_p9 }
  0x19   :  { %33 = vadd.xlane.f32.xlu0 %v32_v4 }
  0x1a   :  { %p122_p12 = pnand %p121_p11, %p115_p8 }
  0xa6   :  { %v34_v5 = vpop.xlane.xlu0 %33 }
  0xa7   :  { %90 = vrsqrt.f32 %v34_v5  ;;  %vm37_vm1 = vcmp.eq.f32.partialorder %v34_v5, inf  ;;  %v40_v8 = vand.u32 2147483648, %v34_v5  ;;  %vm39_vm2 = vcmp.eq.f32.partialorder %v34_v5, 0.0 }
  0xa8   :  { %v47_v16 = vmul.f32 %v44_v11, %v34_v5 }
  0xb1   :  { %v91_v6 = vpop.eup %90 }
  0xb2   :  { %v36_v7 = vmul.f32 %v91_v6, %v34_v5 }
  0xb4   :  { %v38_v9 = vsel %vm37_vm1, %v34_v5, %v36_v7 }
  0xb5   :  { %v41_v10 = vsel %vm39_vm2, %v40_v8, %v38_v9 }
  0xb6   :  { %v45_v12 = vsub.f32 2.0, %v41_v10 }
  0xb8   :  { %v46_v14 = vmax.f32 %v45_v12, 0.0 }
  0xba   :  { %v49_v15 = vmul.f32 %v48_v13, %v46_v14 }
  0xbc   :  { %v50_v17 = vmul.f32 %v49_v15, %v46_v14 }
  0xbe   :  { %v51_v18 = vadd.f32 %v50_v17, %v47_v16 }
  0xc0   :  { %v59_v19 = vsel %vm58_vm3, %v51_v18, 0.0 }
  0xc1   :  { %60 = vadd.xlane.f32.xlu0 %v59_v19 }
 0x14e   :  { %v61_v20 = vpop.xlane.xlu0 %60 }
 0x14f   :  { %v62_v21 = vrot.slane %v61_v20, 4 }
 0x151   :  { %v63_v22 = vadd.f32 %v62_v21, %v61_v20 }
 0x153   :  { %v64_v23 = vrot.slane %v63_v22, 2 }
 0x155   :  { %v65_v24 = vadd.f32 %v64_v23, %v63_v22 }
 0x157   :  { %v66_v25 = vrot.slane %v65_v24, 1 }
 0x159   :  { %v67_v26 = vadd.f32 %v66_v25, %v65_v24 }
 0x15b   :  { %86 = vpush %v67_v26 }
 0x18c   :  { %s87_s27 = spop %86 }
 0x18d   :  { %v69_v27 = vstv %s87_s27 }
 0x18e   :  { %70 = vst [vmem:[#allocation5] sm:$0xff] %v69_v27 }
 0x18f   :  { %125 = shalt.err (!%p122_p12)
}
 0x190   :  { %s126_s4 = scalar_lea.hbm %s195_s3, 128 }
 0x191   :  { %p127_p13 = scmp.ne.s32.totalorder %s195_s3, %s126_s4  ;;  %p130_p0 = scmp.lt.u32.totalorder %s126_s4, %s195_s3 }
 0x193   :  { %p132_p1 = pnand %p130_p0, %p127_p13 }
 0x195   :  { %135 = shalt.err (!%p132_p1)
}
 0x196   :  { %80 = dma.vmem_to_hbm [thread:$0]  %s78_s2, 128, %s195_s3, [#allocation4]  }
 0x197   :  { %138 = dma.done.wait [#allocation4], 128  }
 0x198   :  { %139 = vsyncadd [#allocation4], 4294967168 }
 0x199   :  { %84 = vsyncpa [#allocation3], 1 }
 0x19a   :  { %85 = vsyncpa [#allocation4], 1 }

</bundles_post_ra>
